<compile_context>
chip_gen: v6e
topology: v6e:2x2x1
jax: 0.10.0
libtpu: 0.0.40
codegen_flags: <defaults>
</compile_context>

<pallas_src>
import math
import random as pyrandom
from functools import partial

import jax
import jax.numpy as jnp
from jax.experimental import pallas as pl
from jax.experimental.pallas import tpu as pltpu


def _round_up(x, m):
    return ((x + m - 1) // m) * m


# ----------------------------------------------------------------------------
# Kernel: one grid step == TB batch elements, all math in VMEM.
#   Q_all = (x @ Wq_all + bq) * 1/sqrt(dh);  K_all = x @ Wk_all + bk;  V = x @ Wv + bv
#   scores stacked per head -> one masked softmax over (H, TB, S, S)
#   avg_attn = sum_h softmax_h / H;  out = (avg_attn @ V) @ Wo + bo
# ----------------------------------------------------------------------------
def _sparse_attn_kernel(x_ref, wq_ref, bq_ref, wk_ref, bk_ref,
                        wv_ref, bv_ref, wo_ref, bo_ref, bias_ref,
                        out_ref, attn_ref, *, n_heads, d_head, tb, seq_len):
    f32 = jnp.float32
    mxu_dtype = wq_ref.dtype                      # bf16 (weights pre-cast in wrapper)
    scale = f32(1.0 / math.sqrt(d_head))
    inv_heads = f32(1.0 / n_heads)

    # x arrives in f32 straight from HBM; cast to bf16 for the MXU in-kernel.
    xb = x_ref[...].astype(mxu_dtype)             # (TB*S, D)

    # Fused head projections (one MXU push each).  Bias/scale in f32, cast to
    # bf16 immediately so f32+bf16 copies of a projection are never both live.
    q = (jnp.dot(xb, wq_ref[...], preferred_element_type=f32) + bq_ref[...]) * scale
    qb = q.astype(mxu_dtype).reshape(tb, seq_len, n_heads * d_head)

    k = jnp.dot(xb, wk_ref[...], preferred_element_type=f32) + bk_ref[...]
    kb = k.astype(mxu_dtype).reshape(tb, seq_len, n_heads * d_head)

    v = jnp.dot(xb, wv_ref[...], preferred_element_type=f32) + bv_ref[...]
    vb = v.astype(mxu_dtype).reshape(tb, seq_len, -1)

    # Per-head score matmuls (n_heads small & static -> unrolled at trace time),
    # stacked so bias add / max / exp / sum / reciprocal run once on the whole
    # (H, TB, S, S) block instead of once per head.
    scores = []
    for h in range(n_heads):
        sl = slice(h * d_head, (h + 1) * d_head)
        scores.append(jnp.einsum('bsd,btd->bst', qb[:, :, sl], kb[:, :, sl],
                                 preferred_element_type=f32))      # (TB, S, S)
    s = jnp.stack(scores, axis=0)                                  # (H, TB, S, S)
    s = s + bias_ref[...]                         # additive sparse mask (0 / -1e30)

    m = jnp.max(s, axis=-1, keepdims=True)
    e = jnp.exp(s - m)                            # masked entries -> 0
    denom = jnp.sum(e, axis=-1, keepdims=True)
    p = e * pl.reciprocal(denom)                  # exact per-head probabilities
    attn = jnp.sum(p, axis=0) * inv_heads         # (TB, S, S), single 1/H multiply

    # dropout on avg_attention (eval mode) == identity

    ctx = jnp.einsum('bst,btd->bsd', attn.astype(mxu_dtype), vb,
                     preferred_element_type=f32)                   # (TB, S, D)
    out = (jnp.dot(ctx.reshape(tb * seq_len, -1).astype(mxu_dtype), wo_ref[...],
                   preferred_element_type=f32) + bo_ref[...])

    out_ref[...] = out.astype(out_ref.dtype)                       # (TB*S, D)

    # Lane-dense attention writeback: pad S -> round_up(S, 128) lanes so the
    # HBM writeback of this block is a full, unmasked 128-lane slab.
    attn2d = attn.reshape(tb * seq_len, seq_len).astype(attn_ref.dtype)
    s_pad = attn_ref.shape[1]
    if s_pad > seq_len:
        attn_ref[...] = jnp.zeros(attn_ref.shape, attn_ref.dtype)
        attn_ref[:, :seq_len] = attn2d
    else:
        attn_ref[...] = attn2d


def _choose_batch_tile(B, S, row_target=256):
    """Largest divisor TB of B with TB*S <= ~row_target MXU rows, keeping >= 2
    grid steps (both v7x TensorCores) whenever B allows.
    row_target: 256 fills the 256-wide v6e/v7x MXU; use 128 on v5e (4x128^2)."""
    target = max(1, (row_target + S - 1) // S)
    divisors = [d for d in range(1, B + 1) if B % d == 0]
    usable = [d for d in divisors if B // d >= 2] or divisors
    capped = [d for d in usable if d <= target] or [min(usable)]
    return max(capped)


def sparse_random_attention(x, params, attn_bias, n_heads, d_head,
                            *, mxu_dtype=jnp.bfloat16, row_target=256):
    """x: (B, S, D) f32. Returns (output (B,S,D), avg_attention (B,S,S)) in f32."""
    B, S, D = x.shape
    assert n_heads * d_head == D
    wq, bq, wk, bk, wv, bv, wo, bo = params

    tb = _choose_batch_tile(B, S, row_target)
    rows = tb * S
    grid = (B // tb,)
    s_pad = _round_up(S, 128)          # lane-dense attention output slab width

    # x stays f32 (cast to bf16 happens in-kernel); weights cast once (tiny).
    x_flat = x.reshape(B * S, D)
    wq_m, wk_m, wv_m, wo_m = (w.astype(mxu_dtype) for w in (wq, wk, wv, wo))

    kernel = partial(_sparse_attn_kernel, n_heads=n_heads, d_head=d_head,
                     tb=tb, seq_len=S)

    const2d = lambda a: pl.BlockSpec(a.shape, lambda b: (0, 0))
    grid_spec = pltpu.PrefetchScalarGridSpec(
        num_scalar_prefetch=0,
        grid=grid,
        in_specs=[
            pl.BlockSpec((rows, D), lambda b: (b, 0)),       # x (flattened, f32)
            const2d(wq_m), const2d(bq),                      # Wq (D,H*dh) bf16, bq f32
            const2d(wk_m), const2d(bk),                      # Wk, bk
            const2d(wv_m), const2d(bv),                      # Wv (D,D) bf16, bv f32
            const2d(wo_m), const2d(bo),                      # Wo (D,D) bf16, bo f32
            const2d(attn_bias),                              # additive mask (S,S) f32
        ],
        out_specs=[
            pl.BlockSpec((rows, D), lambda b: (b, 0)),       # output slab
            pl.BlockSpec((rows, s_pad), lambda b: (b, 0)),   # padded attn slab
        ],
    )
    out_shapes = (
        jax.ShapeDtypeStruct((B * S, D), jnp.float32),
        jax.ShapeDtypeStruct((B * S, s_pad), jnp.float32),
    )
    out_flat, attn_padded = pl.pallas_call(
        kernel,
        out_shape=out_shapes,
        grid_spec=grid_spec,
        compiler_params=pltpu.CompilerParams(dimension_semantics=("parallel",)),
    )(x_flat, wq_m, bq, wk_m, bk, wv_m, bv, wo_m, bo, attn_bias)

    return out_flat.reshape(B, S, D), attn_padded[:, :S].reshape(B, S, S)


# ----------------------------------------------------------------------------
# Parameter init (kaiming-normal-like, deterministic) and sparse-mask builder.
# ----------------------------------------------------------------------------
def _kaiming(key, out_f, in_f):
    # PyTorch kaiming_normal_ (fan_in, leaky_relu a=0): std = sqrt(2 / fan_in).
    std = math.sqrt(2.0 / in_f)
    w = jax.random.normal(key, (out_f, in_f), dtype=jnp.float32) * std
    return w.T  # pre-transpose to (in, out) for `x @ W`


def init_params(key, d_model, n_heads, d_head):
    keys = jax.random.split(key, 2 * n_heads + 2)
    # Per-head (D, d_head) weights concatenated along the output dim -> (D, H*dh),
    # so head h occupies columns [h*d_head, (h+1)*d_head).
    wq_all = jnp.concatenate(
        [_kaiming(keys[h], d_head, d_model) for h in range(n_heads)], axis=1)
    wk_all = jnp.concatenate(
        [_kaiming(keys[n_heads + h], d_head, d_model) for h in range(n_heads)], axis=1)
    bq_all = jnp.zeros((1, n_heads * d_head), jnp.float32)
    bk_all = jnp.zeros((1, n_heads * d_head), jnp.float32)
    wv = _kaiming(keys[-2], d_model, d_model)
    bv = jnp.zeros((1, d_model), jnp.float32)
    wo = _kaiming(keys[-1], d_model, d_model)
    bo = jnp.zeros((1, d_model), jnp.float32)
    return wq_all, bq_all, wk_all, bk_all, wv, bv, wo, bo


def build_attention_bias(M, k, seed):
    """Replicates _create_sparse_attention_mask (CLS<->features + k random pairs)
    as an additive float32 bias: 0 where attention is allowed, -1e30 elsewhere."""
    S = 1 + M
    if seed is not None:
        pyrandom.seed(seed)
    all_pairs = [(i, j) for i in range(1, M + 1) for j in range(1, M + 1) if i != j]
    pairs = all_pairs if k >= len(all_pairs) else pyrandom.sample(all_pairs, k)
    allowed = [[False] * S for _ in range(S)]
    for j in range(1, S):
        allowed[0][j] = True
        allowed[j][0] = True
    for i, j in pairs:
        allowed[i][j] = True
        allowed[j][i] = True
    bias = [[0.0 if allowed[i][j] else -1e30 for j in range(S)] for i in range(S)]
    return jnp.array(bias, dtype=jnp.float32)


def _reference(x, params, attn_bias, n_heads, d_head):
    """Pure-JAX f32 reference matching the PyTorch forward (eval mode)."""
    wq, bq, wk, bk, wv, bv, wo, bo = params
    B, S, D = x.shape
    xf = x.reshape(B * S, D)
    q = (xf @ wq + bq).reshape(B, S, n_heads, d_head)
    k = (xf @ wk + bk).reshape(B, S, n_heads, d_head)
    v = (xf @ wv + bv).reshape(B, S, D)
    scores = jnp.einsum('bshd,bthd->bhst', q, k) / math.sqrt(d_head)
    scores = scores + attn_bias
    p = jax.nn.softmax(scores, axis=-1)
    avg = jnp.mean(p, axis=1)                       # (B, S, S)
    out = jnp.einsum('bst,btd->bsd', avg, v)
    out = (out.reshape(B * S, D) @ wo + bo).reshape(B, S, D)
    return out, avg


if __name__ == "__main__":
    # Small shapes consistent with the module: d_model=32, n_heads=4, M=7 -> S=8.
    B, d_model, n_heads, M, k = 2, 32, 4, 7, 3
    d_head = d_model // n_heads
    S = 1 + M

    key = jax.random.PRNGKey(0)
    kx, kp = jax.random.split(key)
    x = jax.random.normal(kx, (B, S, d_model), dtype=jnp.float32)
    params = init_params(kp, d_model, n_heads, d_head)
    attn_bias = build_attention_bias(M, k, seed=0)

    out, avg_attn = sparse_random_attention(x, params, attn_bias, n_heads, d_head)
    jax.block_until_ready((out, avg_attn))

    assert out.shape == (B, S, d_model)
    assert avg_attn.shape == (B, S, S)
    assert bool(jnp.all(jnp.isfinite(out))) and bool(jnp.all(jnp.isfinite(avg_attn)))

    # Each avg-attention row should sum to 1 (exact reciprocal -> tight).
    row_sums = jnp.sum(avg_attn, axis=-1)
    assert bool(jnp.all(jnp.abs(row_sums - 1.0) < 1e-3))

    # Compare against a pure-f32 JAX reference (bf16 MXU operands -> loose tol).
    out_ref, attn_ref = _reference(x, params, attn_bias, n_heads, d_head)
    assert float(jnp.max(jnp.abs(avg_attn - attn_ref))) < 5e-2
    assert float(jnp.max(jnp.abs(out - out_ref))) < 1.5e-1

    print("KERNEL_OK")
</pallas_src>

<mosaic_0001>
module attributes {stable_mosaic.version = 11 : i64} {
  func.func @_sparse_attn_kernel(%arg0: i32, %arg1: memref<8x32xf32, #tpu.memory_space<vmem>>, %arg2: memref<32x32xbf16, #tpu.memory_space<vmem>>, %arg3: memref<1x32xf32, #tpu.memory_space<vmem>>, %arg4: memref<32x32xbf16, #tpu.memory_space<vmem>>, %arg5: memref<1x32xf32, #tpu.memory_space<vmem>>, %arg6: memref<32x32xbf16, #tpu.memory_space<vmem>>, %arg7: memref<1x32xf32, #tpu.memory_space<vmem>>, %arg8: memref<32x32xbf16, #tpu.memory_space<vmem>>, %arg9: memref<1x32xf32, #tpu.memory_space<vmem>>, %arg10: memref<8x8xf32, #tpu.memory_space<vmem>>, %arg11: memref<8x32xf32, #tpu.memory_space<vmem>>, %arg12: memref<8x128xf32, #tpu.memory_space<vmem>>) attributes {dimension_semantics = [#tpu.dimension_semantics<parallel>], iteration_bounds = array<i64: 2>, scalar_prefetch = 0 : i64, scratch_operands = 0 : i64, tpu.core_type = #tpu.core_type<tc>, window_params = [{transform_indices = @transform_0, window_bounds = array<i64: 8, 32>}, {pipeline_mode = #tpu.pipeline_mode<synchronous>, transform_indices = @transform_1, window_bounds = array<i64: 32, 32>}, {pipeline_mode = #tpu.pipeline_mode<synchronous>, transform_indices = @transform_2, window_bounds = array<i64: 1, 32>}, {pipeline_mode = #tpu.pipeline_mode<synchronous>, transform_indices = @transform_3, window_bounds = array<i64: 32, 32>}, {pipeline_mode = #tpu.pipeline_mode<synchronous>, transform_indices = @transform_4, window_bounds = array<i64: 1, 32>}, {pipeline_mode = #tpu.pipeline_mode<synchronous>, transform_indices = @transform_5, window_bounds = array<i64: 32, 32>}, {pipeline_mode = #tpu.pipeline_mode<synchronous>, transform_indices = @transform_6, window_bounds = array<i64: 1, 32>}, {pipeline_mode = #tpu.pipeline_mode<synchronous>, transform_indices = @transform_7, window_bounds = array<i64: 32, 32>}, {pipeline_mode = #tpu.pipeline_mode<synchronous>, transform_indices = @transform_8, window_bounds = array<i64: 1, 32>}, {pipeline_mode = #tpu.pipeline_mode<synchronous>, transform_indices = @transform_9, window_bounds = array<i64: 8, 8>}, {transform_indices = @transform_10, window_bounds = array<i64: 8, 32>}, {transform_indices = @transform_11, window_bounds = array<i64: 8, 128>}]} {
    %c0 = arith.constant 0 : index
    %c0_0 = arith.constant 0 : index
    %0 = vector.load %arg1[%c0, %c0_0] : memref<8x32xf32, #tpu.memory_space<vmem>>, vector<8x32xf32>
    %1 = arith.truncf %0 : vector<8x32xf32> to vector<8x32xbf16>
    %c0_1 = arith.constant 0 : index
    %c0_2 = arith.constant 0 : index
    %2 = vector.load %arg2[%c0_1, %c0_2] : memref<32x32xbf16, #tpu.memory_space<vmem>>, vector<32x32xbf16>
    %cst = arith.constant dense<0.000000e+00> : vector<8x32xf32>
    %3 = tpu.matmul %1, %2, %cst {dimension_numbers = #tpu.dot_dimension_numbers<[1], [0], [0], [1], [0, 0, 1, 1], [], []>} : vector<8x32xbf16>, vector<32x32xbf16>, vector<8x32xf32> -> vector<8x32xf32>
    %c0_3 = arith.constant 0 : index
    %c0_4 = arith.constant 0 : index
    %4 = vector.load %arg3[%c0_3, %c0_4] : memref<1x32xf32, #tpu.memory_space<vmem>>, vector<1x32xf32>
    %5 = vector.broadcast %4 : vector<1x32xf32> to vector<8x32xf32>
    %6 = arith.addf %3, %5 : vector<8x32xf32>
    %cst_5 = arith.constant 0.353553385 : f32
    %7 = vector.broadcast %cst_5 : f32 to vector<8x32xf32>
    %8 = arith.mulf %6, %7 : vector<8x32xf32>
    %9 = arith.truncf %8 : vector<8x32xf32> to vector<8x32xbf16>
    %10 = vector.shape_cast %9 : vector<8x32xbf16> to vector<1x8x32xbf16>
    %c0_6 = arith.constant 0 : index
    %c0_7 = arith.constant 0 : index
    %11 = vector.load %arg4[%c0_6, %c0_7] : memref<32x32xbf16, #tpu.memory_space<vmem>>, vector<32x32xbf16>
    %cst_8 = arith.constant dense<0.000000e+00> : vector<8x32xf32>
    %12 = tpu.matmul %1, %11, %cst_8 {dimension_numbers = #tpu.dot_dimension_numbers<[1], [0], [0], [1], [0, 0, 1, 1], [], []>} : vector<8x32xbf16>, vector<32x32xbf16>, vector<8x32xf32> -> vector<8x32xf32>
    %c0_9 = arith.constant 0 : index
    %c0_10 = arith.constant 0 : index
    %13 = vector.load %arg5[%c0_9, %c0_10] : memref<1x32xf32, #tpu.memory_space<vmem>>, vector<1x32xf32>
    %14 = vector.broadcast %13 : vector<1x32xf32> to vector<8x32xf32>
    %15 = arith.addf %12, %14 : vector<8x32xf32>
    %16 = arith.truncf %15 : vector<8x32xf32> to vector<8x32xbf16>
    %17 = vector.shape_cast %16 : vector<8x32xbf16> to vector<1x8x32xbf16>
    %c0_11 = arith.constant 0 : index
    %c0_12 = arith.constant 0 : index
    %18 = vector.load %arg6[%c0_11, %c0_12] : memref<32x32xbf16, #tpu.memory_space<vmem>>, vector<32x32xbf16>
    %cst_13 = arith.constant dense<0.000000e+00> : vector<8x32xf32>
    %19 = tpu.matmul %1, %18, %cst_13 {dimension_numbers = #tpu.dot_dimension_numbers<[1], [0], [0], [1], [0, 0, 1, 1], [], []>} : vector<8x32xbf16>, vector<32x32xbf16>, vector<8x32xf32> -> vector<8x32xf32>
    %c0_14 = arith.constant 0 : index
    %c0_15 = arith.constant 0 : index
    %20 = vector.load %arg7[%c0_14, %c0_15] : memref<1x32xf32, #tpu.memory_space<vmem>>, vector<1x32xf32>
    %21 = vector.broadcast %20 : vector<1x32xf32> to vector<8x32xf32>
    %22 = arith.addf %19, %21 : vector<8x32xf32>
    %23 = arith.truncf %22 : vector<8x32xf32> to vector<8x32xbf16>
    %24 = vector.shape_cast %23 : vector<8x32xbf16> to vector<1x8x32xbf16>
    %25 = vector.extract_strided_slice %10 {offsets = [0, 0, 0], sizes = [1, 8, 8], strides = [1, 1, 1]} : vector<1x8x32xbf16> to vector<1x8x8xbf16>
    %26 = vector.extract_strided_slice %17 {offsets = [0, 0, 0], sizes = [1, 8, 8], strides = [1, 1, 1]} : vector<1x8x32xbf16> to vector<1x8x8xbf16>
    "tpu.trace_start"() <{level = 10 : i32, message = "bsd,btd->bst"}> : () -> ()
    %cst_16 = arith.constant dense<0.000000e+00> : vector<1x8x8xf32>
    %27 = tpu.matmul %25, %26, %cst_16 {dimension_numbers = #tpu.dot_dimension_numbers<[2], [2], [1], [1], [0, 0, 0, 1, 1, 1], [0], [0]>} : vector<1x8x8xbf16>, vector<1x8x8xbf16>, vector<1x8x8xf32> -> vector<1x8x8xf32>
    "tpu.trace_stop"() : () -> ()
    %28 = vector.extract_strided_slice %10 {offsets = [0, 0, 8], sizes = [1, 8, 8], strides = [1, 1, 1]} : vector<1x8x32xbf16> to vector<1x8x8xbf16>
    %29 = vector.extract_strided_slice %17 {offsets = [0, 0, 8], sizes = [1, 8, 8], strides = [1, 1, 1]} : vector<1x8x32xbf16> to vector<1x8x8xbf16>
    "tpu.trace_start"() <{level = 10 : i32, message = "bsd,btd->bst"}> : () -> ()
    %cst_17 = arith.constant dense<0.000000e+00> : vector<1x8x8xf32>
    %30 = tpu.matmul %28, %29, %cst_17 {dimension_numbers = #tpu.dot_dimension_numbers<[2], [2], [1], [1], [0, 0, 0, 1, 1, 1], [0], [0]>} : vector<1x8x8xbf16>, vector<1x8x8xbf16>, vector<1x8x8xf32> -> vector<1x8x8xf32>
    "tpu.trace_stop"() : () -> ()
    %31 = vector.extract_strided_slice %10 {offsets = [0, 0, 16], sizes = [1, 8, 8], strides = [1, 1, 1]} : vector<1x8x32xbf16> to vector<1x8x8xbf16>
    %32 = vector.extract_strided_slice %17 {offsets = [0, 0, 16], sizes = [1, 8, 8], strides = [1, 1, 1]} : vector<1x8x32xbf16> to vector<1x8x8xbf16>
    "tpu.trace_start"() <{level = 10 : i32, message = "bsd,btd->bst"}> : () -> ()
    %cst_18 = arith.constant dense<0.000000e+00> : vector<1x8x8xf32>
    %33 = tpu.matmul %31, %32, %cst_18 {dimension_numbers = #tpu.dot_dimension_numbers<[2], [2], [1], [1], [0, 0, 0, 1, 1, 1], [0], [0]>} : vector<1x8x8xbf16>, vector<1x8x8xbf16>, vector<1x8x8xf32> -> vector<1x8x8xf32>
    "tpu.trace_stop"() : () -> ()
    %34 = vector.extract_strided_slice %10 {offsets = [0, 0, 24], sizes = [1, 8, 8], strides = [1, 1, 1]} : vector<1x8x32xbf16> to vector<1x8x8xbf16>
    %35 = vector.extract_strided_slice %17 {offsets = [0, 0, 24], sizes = [1, 8, 8], strides = [1, 1, 1]} : vector<1x8x32xbf16> to vector<1x8x8xbf16>
    "tpu.trace_start"() <{level = 10 : i32, message = "bsd,btd->bst"}> : () -> ()
    %cst_19 = arith.constant dense<0.000000e+00> : vector<1x8x8xf32>
    %36 = tpu.matmul %34, %35, %cst_19 {dimension_numbers = #tpu.dot_dimension_numbers<[2], [2], [1], [1], [0, 0, 0, 1, 1, 1], [0], [0]>} : vector<1x8x8xbf16>, vector<1x8x8xbf16>, vector<1x8x8xf32> -> vector<1x8x8xf32>
    "tpu.trace_stop"() : () -> ()
    %37 = vector.shape_cast %27 : vector<1x8x8xf32> to vector<1x1x8x8xf32>
    %38 = vector.shape_cast %30 : vector<1x8x8xf32> to vector<1x1x8x8xf32>
    %39 = vector.shape_cast %33 : vector<1x8x8xf32> to vector<1x1x8x8xf32>
    %40 = vector.shape_cast %36 : vector<1x8x8xf32> to vector<1x1x8x8xf32>
    %41 = tpu.concatenate %37, %38, %39, %40 in 0 : vector<1x1x8x8xf32>, vector<1x1x8x8xf32>, vector<1x1x8x8xf32>, vector<1x1x8x8xf32> -> vector<4x1x8x8xf32>
    %c0_20 = arith.constant 0 : index
    %c0_21 = arith.constant 0 : index
    %42 = vector.load %arg10[%c0_20, %c0_21] : memref<8x8xf32, #tpu.memory_space<vmem>>, vector<8x8xf32>
    %43 = vector.shape_cast %42 : vector<8x8xf32> to vector<1x1x8x8xf32>
    %44 = vector.broadcast %43 : vector<1x1x8x8xf32> to vector<4x1x8x8xf32>
    %45 = arith.addf %41, %44 : vector<4x1x8x8xf32>
    %cst_22 = arith.constant dense<0xFF800000> : vector<4x1x8xf32>
    %46 = vector.multi_reduction <maximumf>, %45, %cst_22 [3] : vector<4x1x8x8xf32> to vector<4x1x8xf32>
    %47 = vector.shape_cast %46 : vector<4x1x8xf32> to vector<4x1x8x1xf32>
    %48 = vector.broadcast %47 : vector<4x1x8x1xf32> to vector<4x1x8x8xf32>
    %49 = arith.subf %45, %48 : vector<4x1x8x8xf32>
    %50 = math.exp %49 : vector<4x1x8x8xf32>
    %cst_23 = arith.constant dense<0.000000e+00> : vector<4x1x8xf32>
    %51 = vector.multi_reduction <add>, %50, %cst_23 [3] : vector<4x1x8x8xf32> to vector<4x1x8xf32>
    %52 = vector.shape_cast %51 : vector<4x1x8xf32> to vector<4x1x8x1xf32>
    %53 = tpu.reciprocal %52 : vector<4x1x8x1xf32> -> vector<4x1x8x1xf32>
    %54 = vector.broadcast %53 : vector<4x1x8x1xf32> to vector<4x1x8x8xf32>
    %55 = arith.mulf %50, %54 : vector<4x1x8x8xf32>
    %cst_24 = arith.constant dense<0.000000e+00> : vector<1x8x8xf32>
    %56 = vector.multi_reduction <add>, %55, %cst_24 [0] : vector<4x1x8x8xf32> to vector<1x8x8xf32>
    %cst_25 = arith.constant 2.500000e-01 : f32
    %57 = vector.broadcast %cst_25 : f32 to vector<1x8x8xf32>
    %58 = arith.mulf %56, %57 : vector<1x8x8xf32>
    %59 = arith.truncf %58 : vector<1x8x8xf32> to vector<1x8x8xbf16>
    "tpu.trace_start"() <{level = 10 : i32, message = "bst,btd->bsd"}> : () -> ()
    %cst_26 = arith.constant dense<0.000000e+00> : vector<1x8x32xf32>
    %60 = tpu.matmul %59, %24, %cst_26 {dimension_numbers = #tpu.dot_dimension_numbers<[2], [1], [1], [2], [0, 0, 0, 1, 1, 2], [0], [0]>} : vector<1x8x8xbf16>, vector<1x8x32xbf16>, vector<1x8x32xf32> -> vector<1x8x32xf32>
    "tpu.trace_stop"() : () -> ()
    %61 = vector.shape_cast %60 : vector<1x8x32xf32> to vector<8x32xf32>
    %62 = arith.truncf %61 : vector<8x32xf32> to vector<8x32xbf16>
    %c0_27 = arith.constant 0 : index
    %c0_28 = arith.constant 0 : index
    %63 = vector.load %arg8[%c0_27, %c0_28] : memref<32x32xbf16, #tpu.memory_space<vmem>>, vector<32x32xbf16>
    %cst_29 = arith.constant dense<0.000000e+00> : vector<8x32xf32>
    %64 = tpu.matmul %62, %63, %cst_29 {dimension_numbers = #tpu.dot_dimension_numbers<[1], [0], [0], [1], [0, 0, 1, 1], [], []>} : vector<8x32xbf16>, vector<32x32xbf16>, vector<8x32xf32> -> vector<8x32xf32>
    %c0_30 = arith.constant 0 : index
    %c0_31 = arith.constant 0 : index
    %65 = vector.load %arg9[%c0_30, %c0_31] : memref<1x32xf32, #tpu.memory_space<vmem>>, vector<1x32xf32>
    %66 = vector.broadcast %65 : vector<1x32xf32> to vector<8x32xf32>
    %67 = arith.addf %64, %66 : vector<8x32xf32>
    %c0_32 = arith.constant 0 : index
    %c0_33 = arith.constant 0 : index
    %68 = vector.load %arg11[%c0_32, %c0_33] : memref<8x32xf32, #tpu.memory_space<vmem>>, vector<8x32xf32>
    tpu.vector_store %arg11[%c0_32, %c0_33], %67 {strides = array<i32>} : memref<8x32xf32, #tpu.memory_space<vmem>>, vector<8x32xf32>,
    %69 = vector.shape_cast %58 : vector<1x8x8xf32> to vector<8x8xf32>
    %cst_34 = arith.constant 0.000000e+00 : f32
    %70 = vector.broadcast %cst_34 : f32 to vector<8x128xf32>
    %c0_35 = arith.constant 0 : index
    %c0_36 = arith.constant 0 : index
    %71 = vector.load %arg12[%c0_35, %c0_36] : memref<8x128xf32, #tpu.memory_space<vmem>>, vector<8x128xf32>
    tpu.vector_store %arg12[%c0_35, %c0_36], %70 {strides = array<i32>} : memref<8x128xf32, #tpu.memory_space<vmem>>, vector<8x128xf32>,
    %c0_37 = arith.constant 0 : index
    %c0_38 = arith.constant 0 : index
    %72 = vector.load %arg12[%c0_37, %c0_38] : memref<8x128xf32, #tpu.memory_space<vmem>>, vector<8x8xf32>
    tpu.vector_store %arg12[%c0_37, %c0_38], %69 {strides = array<i32>} : memref<8x128xf32, #tpu.memory_space<vmem>>, vector<8x8xf32>,
    return
  }
  func.func @transform_0(%arg0: i32) -> (i32, i32) {
    %c0_i32 = arith.constant 0 : i32
    %c0_i32_0 = arith.constant 0 : i32
    return %arg0, %c0_i32 : i32, i32
  }
  func.func @transform_1(%arg0: i32) -> (i32, i32) {
    %c0_i32 = arith.constant 0 : i32
    %c0_i32_0 = arith.constant 0 : i32
    %c0_i32_1 = arith.constant 0 : i32
    return %c0_i32, %c0_i32_0 : i32, i32
  }
  func.func @transform_2(%arg0: i32) -> (i32, i32) {
    %c0_i32 = arith.constant 0 : i32
    %c0_i32_0 = arith.constant 0 : i32
    %c0_i32_1 = arith.constant 0 : i32
    return %c0_i32, %c0_i32_0 : i32, i32
  }
  func.func @transform_3(%arg0: i32) -> (i32, i32) {
    %c0_i32 = arith.constant 0 : i32
    %c0_i32_0 = arith.constant 0 : i32
    %c0_i32_1 = arith.constant 0 : i32
    return %c0_i32, %c0_i32_0 : i32, i32
  }
  func.func @transform_4(%arg0: i32) -> (i32, i32) {
    %c0_i32 = arith.constant 0 : i32
    %c0_i32_0 = arith.constant 0 : i32
    %c0_i32_1 = arith.constant 0 : i32
    return %c0_i32, %c0_i32_0 : i32, i32
  }
  func.func @transform_5(%arg0: i32) -> (i32, i32) {
    %c0_i32 = arith.constant 0 : i32
    %c0_i32_0 = arith.constant 0 : i32
    %c0_i32_1 = arith.constant 0 : i32
    return %c0_i32, %c0_i32_0 : i32, i32
  }
  func.func @transform_6(%arg0: i32) -> (i32, i32) {
    %c0_i32 = arith.constant 0 : i32
    %c0_i32_0 = arith.constant 0 : i32
    %c0_i32_1 = arith.constant 0 : i32
    return %c0_i32, %c0_i32_0 : i32, i32
  }
  func.func @transform_7(%arg0: i32) -> (i32, i32) {
    %c0_i32 = arith.constant 0 : i32
    %c0_i32_0 = arith.constant 0 : i32
    %c0_i32_1 = arith.constant 0 : i32
    return %c0_i32, %c0_i32_0 : i32, i32
  }
  func.func @transform_8(%arg0: i32) -> (i32, i32) {
    %c0_i32 = arith.constant 0 : i32
    %c0_i32_0 = arith.constant 0 : i32
    %c0_i32_1 = arith.constant 0 : i32
    return %c0_i32, %c0_i32_0 : i32, i32
  }
  func.func @transform_9(%arg0: i32) -> (i32, i32) {
    %c0_i32 = arith.constant 0 : i32
    %c0_i32_0 = arith.constant 0 : i32
    %c0_i32_1 = arith.constant 0 : i32
    return %c0_i32, %c0_i32_0 : i32, i32
  }
  func.func @transform_10(%arg0: i32) -> (i32, i32) {
    %c0_i32 = arith.constant 0 : i32
    %c0_i32_0 = arith.constant 0 : i32
    return %arg0, %c0_i32 : i32, i32
  }
  func.func @transform_11(%arg0: i32) -> (i32, i32) {
    %c0_i32 = arith.constant 0 : i32
    %c0_i32_0 = arith.constant 0 : i32
    return %arg0, %c0_i32 : i32, i32
  }
}

</mosaic_0001>

<bundles_post_ra>
// kernel: tpu_custom_call.1
= control target key start
LH: loop header
LB: loop body
LE: loop exit
PB: predicated region body
PF: predicated region fallthrough
CT: control target
= control target key end

     0   :  { %s2109_s0 = inlined_call_operand.hbm [shape: f32[16,32], index: 0, kind: input, shape index: {}]   ;;  %s2110_s1 = inlined_call_operand.hbm [shape: bf16[32,32], index: 1, kind: input, shape index: {}]   ;;  %s2111_s2 = inlined_call_operand.vmem [shape: f32[1,32], index: 2, kind: input, shape index: {}]   ;;  %s2112_s3 = inlined_call_operand.hbm [shape: bf16[32,32], index: 3, kind: input, shape index: {}]   ;;  %s2113_s4 = inlined_call_operand.vmem [shape: f32[1,32], index: 4, kind: input, shape index: {}]   ;;  %s2114_s5 = inlined_call_operand.hbm [shape: bf16[32,32], index: 5, kind: input, shape index: {}]   ;;  %s2115_s6 = inlined_call_operand.vmem [shape: f32[1,32], index: 6, kind: input, shape index: {}]   ;;  %s2116_s7 = inlined_call_operand.hbm [shape: bf16[32,32], index: 7, kind: input, shape index: {}]   ;;  %s2117_s8 = inlined_call_operand.vmem [shape: f32[1,32], index: 8, kind: input, shape index: {}]   ;;  %s2118_s9 = inlined_call_operand.vmem [shape: f32[8,8], index: 9, kind: input, shape index: {}]   ;;  %s2119_s10 = inlined_call_operand.hbm [shape: f32[16,32], index: 10, kind: output, shape index: {0}]   ;;  %s2120_s11 = inlined_call_operand.hbm [shape: f32[16,128], index: 11, kind: output, shape index: {1}]  }
   0x1   :  { %2126 = sst [smem:[#allocation21_spill]] %s2110_s1 }
   0x2   :  { %2127 = sst [smem:[#allocation22_spill]] %s2112_s3 }
   0x3   :  { %2128 = sst [smem:[#allocation23_spill]] %s2114_s5 }
   0x4   :  { %2129 = sst [smem:[#allocation24_spill]] %s2116_s7 }
   0x5   :  { %17 = vsyncpa [#allocation3], 0 }
   0x6   :  { %19 = vsyncpa [#allocation3 + $0x1], 0 }
   0x7   :  { %20 = vsyncpa [#allocation6], 0 }
   0x8   :  { %21 = vsyncpa [#allocation9], 0 }
   0x9   :  { %22 = vsyncpa [#allocation4], 0 }
   0xa   :  { %24 = vsyncpa [#allocation4 + $0x1], 0 }
   0xb   :  { %25 = vsyncpa [#allocation13], 0 }
   0xc   :  { %27 = vsyncpa [#allocation13 + $0x1], 0  ;;  %s1778_s17 = smov 0   ;;  %s1780_s18 = smov 0  }
   0xd   :  { %s1782_s19 = smov 0   ;;  %s1784_s20 = smov 0  }
   0xe LB: > { %2130 = sst [smem:[#allocation19_spill]] %s1698_s19  ;;  %s1704_s21 = smov [#allocation5]   ;;  %s1702_s20 = sphi %s1784_s20, %s2156_s20   ;;  %s1698_s19 = sphi %s1782_s19, %s2153_s19   ;;  %s1694_s18 = sphi %s1780_s18, %s2155_s18   ;;  %s1690_s17 = sphi %s1778_s17, %s2154_s17  }
   0xf   : > { %s317_s22 = sshll.u32 %s1704_s21, 4  ;;  %s1799_s23 = sadd.s32 4294967295, %s1702_s20   ;;  %s318_s22 = int_to_ptr.vmem [resolvable:$true] %s317_s22 }
  0x10   : > { %p1218_p0 = scmp.ge.s32.totalorder %s1702_s20, 1  ;;  %p2121_p1 = scmp.eq.s32.totalorder %s1799_s23, 0 }
  0x11   : > { %p305_p2 = scmp.lt.s32.totalorder %s1702_s20, 3  ;;  %s1705_s25 = smov [#allocation8]  }
  0x12   : > { %s349_s26 = sshll.u32 %s1705_s25, 4  ;;  %s1706_s28 = smov [#allocation7]   ;;  %s1817_s26 = int_to_ptr.vmem [resolvable:$true] %s349_s26 }
  0x13   : > { %p1804_p3 = pnand %p1218_p0, %p305_p2  ;;  %s333_s29 = sshll.u32 %s1706_s28, 4  ;;  %s1819_s29 = int_to_ptr.vmem [resolvable:$true] %s333_s29 }
  0x14   : > { %s1479_s30 = scalar_lea.vmem %s318_s22, 256  ;;  %p1487_p11 = scmp.lt.s32.totalorder %s318_s22, %s318_s22 }
  0x15   : > { %s2131_s24 = scalar_select %p1804_p3, 1, 0 }
  0x16   : > { %p1367_p5 = pneg %p1804_p3  ;;  %p1480_p8 = scmp.ne.s32.totalorder %s318_s22, %s1479_s30 }
  0x17   : > { %p1488_p12 = scmp.lt.s32.totalorder %s1479_s30, %s1479_s30 }
  0x18   : > { %p1813_p6 = pnand %p1367_p5, %p2121_p1 }
  0x19   : > { %p1489_p13 = por %p1488_p12, %p1487_p11 }
  0x1a   : > { %p1470_p7 = pneg %p1813_p6 }
  0x1c   : > { %p1482_p9 = pnand %p1480_p8, %p1470_p7 }
  0x1e   : > { %p1483_p10 = pneg %p1482_p9 }
  0x20   : > { %p1490_p0 = pnand %p1489_p13, %p1483_p10 }
  0x22   : > { %1493 = shalt.err (!%p1490_p0)
}
  0x23   : > { %s1707_s12 = smov 64   ;;  %s1708_s13 = smov 4  }
  0x24   : > { %s2133_s1 = sld [smem:[#allocation21_spill]]  ;;  %s1505_s16 = scalar_lea.vmem %s1817_s26, 256 }
  0x25   : > { %p1506_p2 = scmp.ne.s32.totalorder %s1817_s26, %s1505_s16  ;;  %p1513_p9 = scmp.lt.s32.totalorder %s1817_s26, %s1817_s26 }
  0x26   : > { %p1514_p10 = scmp.lt.s32.totalorder %s1505_s16, %s1505_s16 }
  0x27   : > { %p1508_p5 = pnand %p1506_p2, %p1470_p7 }
  0x28   : > { %p1515_p11 = por %p1514_p10, %p1513_p9 }
  0x29   : > { %p1509_p8 = pneg %p1508_p5 }
  0x2a   : > { %1370 = dma.hbm_to_vmem [thread:$0]  (!%p1813_p6), %s2133_s1, 256, %s318_s22, [#allocation6], %s1707_s12, %s1707_s12, %s1708_s13  }
  0x2b   : > { %p1516_p12 = pnand %p1515_p11, %p1509_p8 }
  0x2d   : > { %1519 = shalt.err (!%p1516_p12)
}
  0x2e   : > { %s2134_s5 = sld [smem:[#allocation23_spill]]  ;;  %s1531_s25 = scalar_lea.vmem %s1819_s29, 256 }
  0x2f   : > { %p1532_p13 = scmp.ne.s32.totalorder %s1819_s29, %s1531_s25  ;;  %p1539_p5 = scmp.lt.s32.totalorder %s1819_s29, %s1819_s29 }
  0x30   : > { %p1540_p8 = scmp.lt.s32.totalorder %s1531_s25, %s1531_s25 }
  0x31   : > { %p1534_p0 = pnand %p1532_p13, %p1470_p7 }
  0x32   : > { %p1541_p9 = por %p1540_p8, %p1539_p5 }
  0x33   : > { %p1535_p2 = pneg %p1534_p0 }
  0x34   : > { %1376 = dma.hbm_to_vmem [thread:$0]  (!%p1813_p6), %s2134_s5, 256, %s1817_s26, [#allocation9], %s1707_s12, %s1707_s12, %s1708_s13  }
  0x35   : > { %p1542_p10 = pnand %p1541_p9, %p1535_p2 }
  0x37   : > { %1545 = shalt.err (!%p1542_p10)
}
  0x38   : > { %s2135_s3 = sld [smem:[#allocation22_spill]]  ;;  %s1709_s30 = smov [#allocation10]  }
  0x39   : > { %s365_s14 = sshll.u32 %s1709_s30, 4  ;;  %s366_s14 = int_to_ptr.vmem [resolvable:$true] %s365_s14 }
  0x3a   : > { %s1557_s15 = scalar_lea.vmem %s366_s14, 256  ;;  %p1565_p0 = scmp.lt.s32.totalorder %s366_s14, %s366_s14 }
  0x3b   : > { %p1558_p11 = scmp.ne.s32.totalorder %s366_s14, %s1557_s15  ;;  %p1566_p2 = scmp.lt.s32.totalorder %s1557_s15, %s1557_s15 }
  0x3d   : > { %p1560_p12 = pnand %p1558_p11, %p1470_p7  ;;  %p1567_p5 = por %p1566_p2, %p1565_p0 }
  0x3e   : > { %1373 = dma.hbm_to_vmem [thread:$0]  (!%p1813_p6), %s2135_s3, 256, %s1819_s29, [#allocation6], %s1707_s12, %s1707_s12, %s1708_s13  }
  0x3f   : > { %p1561_p13 = pneg %p1560_p12 }
  0x41   : > { %p1568_p8 = pnand %p1567_p5, %p1561_p13 }
  0x43   : > { %1571 = shalt.err (!%p1568_p8)
}
  0x44   : > { %s2136_s7 = sld [smem:[#allocation24_spill]]  ;;  %s1217_s27 = sadd.s32 4294967294, %s1702_s20  }
  0x45   : > { %s1879_s21 = sadd.s32 1, %s1702_s20   ;;  %s40_s25 = sadd.s32 1, %s1698_s19 }
  0x46   : > { %s37_s22 = ssub.s32 %s1702_s20, %s1879_s21  ;;  %p47_p9 = scmp.ne.s32.totalorder %s1698_s19, %s1694_s18 }
  0x47   : > { %p38_p7 = scmp.eq.s32.totalorder %s37_s22, 0  ;;  %p48_p10 = scmp.eq.s32.totalorder %s1702_s20, 0 }
  0x48   : > { %p53_p11 = scmp.ne.s32.totalorder %s1694_s18, %s1690_s17  ;;  %p266_p13 = scmp.eq.s32.totalorder %s1799_s23, 1 }
  0x49   : > { %s1890_s28 = scalar_select %p38_p7, %s1698_s19, %s40_s25  }
  0x4a   : > { %1379 = dma.hbm_to_vmem [thread:$0]  (!%p1813_p6), %s2136_s7, 256, %s366_s14, [#allocation9], %s1707_s12, %s1707_s12, %s1708_s13  }
  0x4b   : > { %2137 = sst [smem:[#allocation20_spill]] %s1890_s28  ;;  %p1892_p12 = por %p48_p10, %p47_p9 }
  0x4c   : > { %p1898_p6 = por %p2121_p1, %p53_p11  ;;  %p272_p0 = scmp.eq.s32.totalorder %s1217_s27, 1 }
  0x4d   : > { %p1395_p2 = scmp.lt.s32.totalorder %s1702_s20, 2  ;;  %s385_s13 = sand.u32 1, %s1698_s19  }
  0x4e   : > { %s2139_s12 = scalar_select %p1898_p6, 1, 0 }
  0x4f   : > { %p1905_p5 = por %p266_p13, %p47_p9  ;;  %p1909_p8 = por %p272_p0, %p53_p11 }
  0x50   : > { %s1224_s15 = sshll.u32 %s385_s13, 3  ;;  %s1225_s29 = sshll.u32 %s1702_s20, 7 }
  0x51   : > { %s2140_s30 = scalar_select %p1905_p5, 1, 0 }
  0x52   : > { %s2141_s14 = scalar_select %p1909_p8, 1, 0 }
  0x53   : > { %s1917_s25 = scalar_lea.hbm %s2109_s0, %s1225_s29  ;;  %s389_s27 = scalar_lea.vmem [#allocation2], %s1224_s15 }
  0x54   : > { %s396_s1 = sshll.u32 %s389_s27, 4  ;;  %p1921_p7 = pnand %p1395_p2, %p1892_p12  ;;  %s397_s1 = int_to_ptr.vmem [resolvable:$true] %s396_s1 }
  0x55   : > { %s386_s5 = scalar_lea.sflag [#allocation3], %s385_s13  ;;  %s1572_s7 = scalar_lea.hbm %s1917_s25, 128 }
  0x56   : > { %p1573_p9 = scmp.ne.s32.totalorder %s1917_s25, %s1572_s7  ;;  %p1574_p10 = pneg %p1921_p7 }
  0x57   : > { %s1577_s22 = scalar_lea.hbm %s2109_s0, 256  ;;  %p1578_p0 = scmp.lt.s32.totalorder %s1917_s25, %s2109_s0 }
  0x58   : > { %p1575_p11 = pnand %p1574_p10, %p1573_p9  ;;  %p1579_p12 = scmp.lt.s32.totalorder %s1577_s22, %s1572_s7 }
  0x5a   : > { %p1576_p13 = pneg %p1575_p11  ;;  %p1580_p2 = por %p1579_p12, %p1578_p0 }
  0x5c   : > { %p1581_p4 = pnand %p1580_p2, %p1576_p13 }
  0x5e   : > { %1584 = shalt.err (!%p1581_p4)
}
  0x5f   : > { %s1585_s26 = scalar_lea.vmem %s397_s1, 128  ;;  %s1710_s13 = smov [#allocation2]  }
  0x60   : > { %p1586_p1 = scmp.ne.s32.totalorder %s397_s1, %s1585_s26  ;;  %s1590_s28 = sshll.u32 %s1710_s13, 4  ;;  %s1591_s28 = int_to_ptr.vmem [resolvable:$false] %s1590_s28 }
  0x61   : > { %s1592_s19 = scalar_lea.vmem %s1591_s28, 256  ;;  %p1593_p9 = scmp.lt.s32.totalorder %s397_s1, %s1591_s28 }
  0x62   : > { %p1588_p8 = pnand %p1586_p1, %p1574_p10  ;;  %p1594_p11 = scmp.lt.s32.totalorder %s1592_s19, %s1585_s26 }
  0x64   : > { %p1589_p5 = pneg %p1588_p8  ;;  %p1595_p6 = por %p1594_p11, %p1593_p9 }
  0x66   : > { %p1596_p3 = pnand %p1595_p6, %p1589_p5 }
  0x68   : > { %1599 = shalt.err (!%p1596_p3)
}
  0x69   : > { %1383 = dma.hbm_to_vmem [thread:$0]  (!%p1921_p7), %s1917_s25, 128, %s397_s1, %s386_s5  }
  0x6a   : > { %p2143_p13 = scmp.ne.s32.totalorder %s2131_s24, 0 }
  0x6b   : > { %s1942_s7 = sand.u32 (!%p2143_p13), 1, %s1694_s18   ;;  %p2144_p1 = scmp.ne.s32.totalorder (!%p2143_p13), %s2139_s12, 0 }
  0x6c   : > { %405 = sbr.rel (%p2143_p13) target bundleno = 1376 (0x560), region = 60  ;;  %s1945_s29 = sshll.u32 (!%p2143_p13), %s1942_s7, 3 }
  0x6d   : > { %s408_s19 = scalar_lea.sflag (!%p2143_p13), [#allocation3], %s1942_s7  ;;  %s411_s28 = scalar_lea.vmem (!%p2143_p13), [#allocation2], %s1945_s29 }
  0x71   : > { %1669 = dma.done.wait (%p2144_p1), %s408_s19, 128  }
  0x72   : > { %1671 = vsyncadd (%p2144_p1), %s408_s19, 4294967168  ;;  %p2145_p3 = scmp.eq.s32.totalorder %s1799_s23, 0 }
  0x74   : > { %1673 = dma.done.wait (%p2145_p3), [#allocation6], 512   ;;  %p2146_p4 = pmov %p2145_p3 }
  0x75   : > { %p2147_p6 = pmov %p2145_p3 }
  0x76   : > { %1675 = vsyncadd (%p2146_p4), [#allocation6], 4294966784 }
  0x77   : > { %1677 = dma.done.wait (%p2147_p6), [#allocation9], 512   ;;  %p2148_p5 = pmov %p2145_p3 }
  0x78   : > { %v1711_v0 = vmov 0.0   ;;  %vm1712_vm0 = vmmov 0   ;;  %v1444_v1 = vld [vmem:[#allocation5 + $0x8] sm:$0xff]   ;;  %v1445_v2 = vld [vmem:[#allocation7 + $0x8] sm:$0xff]   ;;  %v1446_v3 = vld [vmem:[#allocation5] sm:$0xff]   ;;  %vm497_vm1 = vcmask 261120  }
  0x79   : > { %1679 = vsyncadd (%p2148_p5), [#allocation9], 4294966784  ;;  %1283 = vmatprep.subr.bf16.mxu0 %v1711_v0  ;;  %1291 = vmatprep.subr.bf16.mxu1 %v1711_v0  ;;  %v1447_v4 = vld [vmem:[#allocation7] sm:$0xff]   ;;  %v1448_v7 = vld [vmem:[#allocation8 + $0x8] sm:$0xff]   ;;  %vm671_vm2 = vcmask 64512   ;;  %s1713_s12 = smov 120  }
  0x7a   : > { %1287 = vmatprep.mubr.msk.bf16.mxu0 %vm1712_vm0, %v1711_v0  ;;  %1295 = vmatprep.mubr.msk.bf16.mxu1 %vm1712_vm0, %v1711_v0  ;;  %v472_v5 = vld [vmem:[%s411_s28] sm:$0xff]  ;;  %v1449_v8 = vld [vmem:[#allocation8] sm:$0xff]   ;;  %s1714_s25 = smov 112   ;;  %s1715_s16 = smov 104   ;;  %vm931_vm3 = vcmask 1043456  }
  0x7b   : > { %1284 = vmatpush3.bf16.msra.mxu0 %v1444_v1  ;;  %1292 = vmatpush3.bf16.msra.mxu1 %v1445_v2  ;;  %v473_v6 = vpack.c.bf16 %v472_v5, %v472_v5  ;;  %v1234_v9 = vld [vmem:[%s2111_s2] ss:$0 sm:$0xff]  ;;  %s2023_s13 = scalar_lea.vmem [#allocation12], %s1945_s29  ;;  %s1257_s19 = sshll.u32 %s1799_s23, 7 }
  0x7c   : > { %1285 = vmatprep.subr.bf16.mxu0 %v1711_v0  ;;  %1293 = vmatprep.subr.bf16.mxu1 %v1711_v0  ;;  %v1238_v10 = vld [vmem:[%s2113_s4] ss:$0 sm:$0xff]  ;;  %1043 = vst [vmem:[%s2023_s13] sm:$0xff] %v1711_v0  ;;  %s1075_s3 = scalar_lea.hbm %s2120_s11, %s1257_s19  ;;  %s1077_s5 = sshll.u32 %s2023_s13, 4  ;;  %s1078_s5 = int_to_ptr.vmem [resolvable:$true] %s1077_s5 }
  0x7d   : > { %v1242_v30 = vld [vmem:[%s2115_s6] ss:$0 sm:$0xff]  ;;  %s1051_s24 = scalar_lea.sflag [#allocation13], %s1942_s7  ;;  %p2149_p7 = scmp.ne.s32.totalorder %s2140_s30, 0 }
  0x7e   : > { %v870_v42 = vld [vmem:[%s2118_s9] sm:$0xff] }
  0x7f   : > { %1286 = vmatpush3.bf16.msra.mxu0 %v1446_v3  ;;  %1294 = vmatpush3.bf16.msra.mxu1 %v1447_v4 }
  0x80   : > { %1299 = vmatprep.subr.bf16.mxu0 %v1711_v0  ;;  %1307 = vmatprep.subr.bf16.mxu1 %v1711_v0 }
  0x82   : > { %1288 = vmatmul.mubr.msk.bf16.vlgmr.msra.gmra.mxu0 %vm497_vm1, %v473_v6  ;;  %1296 = vmatmul.mubr.msk.bf16.vlgmr.msra.gmra.mxu1 %vm497_vm1, %v473_v6 }
  0x83   : > { %1303 = vmatprep.mubr.msk.bf16.mxu0 %vm1712_vm0, %v1711_v0  ;;  %1309 = vmatprep.mubr.msk.bf16.mxu1 %vm1712_vm0, %v1711_v0 }
  0x84   : > { %1300 = vmatpush3.bf16.msra.mxu0 %v1448_v7 }
  0x85   : > { %1301 = vmatprep.subr.bf16.mxu0 %v1711_v0 }
  0x88   : > { %1302 = vmatpush3.bf16.msra.mxu0 %v1449_v8 }
  0x89   : > { %1313 = vmatprep.subr.bf16.mxu0 %v1711_v0 }
  0x8b   : > { %1304 = vmatmul.mubr.msk.bf16.vlgmr.msra.gmra.mxu0 %vm497_vm1, %v473_v6 }
  0x8c   : > { %1315 = vmatprep.mubr.msk.bf16.mxu0 %vm1712_vm0, %v1711_v0 }
 0x142   : > { %v535_v11 = vpop.f32.mrf.mxu0  ;;  %v600_v13 = vpop.f32.mrf.mxu1 }
 0x143   : > { %v536_v12 = vadd.f32 %v1234_v9, %v535_v11  ;;  %v601_v14 = vadd.f32 %v1238_v10, %v600_v13 }
 0x144   : > { %v1289_v15 = vpop.f32.mrf.mxu0  ;;  %v1297_v17 = vpop.f32.mrf.mxu1 }
 0x145   : > { %v541_v16 = vmul.f32 0.35355338, %v536_v12  ;;  %v606_v18 = vpack.c.bf16 %v601_v14, %v601_v14 }
 0x146   : > { %v538_v19 = vpop.f32.mrf.mxu0  ;;  %v603_v21 = vpop.f32.mrf.mxu1 }
 0x147   : > { %v542_v20 = vpack.c.bf16 %v541_v16, %v541_v16  ;;  %722 = vrot.lane.b32.xlu0 %v606_v18, %s1713_s12  ;;  %v676_v23 = vsel %vm671_vm2, %v606_v18, 0 }
 0x148   : > { %v1290_v22 = vpop.f32.mrf.mxu0  ;;  %v1298_v24 = vpop.f32.mrf.mxu1  ;;  %1308 = vmatpush3.bf16.xpose.msra.mxu1 %v676_v23 }
 0x149   : > { %719 = vrot.lane.b32.xlu1 %v542_v20, %s1713_s12  ;;  %1319 = vmatprep.subr.bf16.mxu1 %v1711_v0  ;;  %v1450_v24 = vld [vmem:[#allocation10 + $0x8] sm:$0xff]   ;;  %s1600_s12 = scalar_lea.vmem %s1078_s5, 128 }
 0x14a   : > { %p1601_p8 = scmp.ne.s32.totalorder %s1078_s5, %s1600_s12 }
 0x14b   : > { %772 = vrot.lane.b32.xlu0 %v606_v18, %s1714_s25  ;;  %v664_v25 = vpop.f32.mrf.mxu0 }
 0x14c   : > { %v665_v33 = vadd.f32 %v1242_v30, %v664_v25  ;;  %p1602_p10 = pnand %p1601_p8, %p2149_p7 }
 0x14d   : > { %822 = vrot.lane.b32.xlu1 %v606_v18, %s1715_s16  ;;  %v1305_v26 = vpop.f32.mrf.mxu0 }
 0x14e   : > { %v670_v37 = vpack.c.bf16 %v665_v33, %v665_v33  ;;  %p1603_p0 = pneg %p1602_p10 }
 0x14f   : > { %770 = vrot.lane.b32.xlu0 %v542_v20, %s1714_s25  ;;  %1310 = vmatmul.mubr.msk.bf16.vlgmr.msra.gmra.mxu1 %vm671_vm2, %v542_v20  ;;  %v667_v27 = vpop.f32.mrf.mxu0  ;;  %s1716_s25 = smov [#allocation12]  }
 0x150   : > { %1321 = vmatprep.mubr.msk.bf16.mxu1 %vm1712_vm0, %v1711_v0  ;;  %v933_v39 = vsel %vm931_vm3, %v670_v37, 0 }
 0x151   : > { %820 = vrot.lane.b32.xlu1 %v542_v20, %s1715_s16  ;;  %v1306_v28 = vpop.f32.mrf.mxu0  ;;  %s1604_s16 = sshll.u32 %s1716_s25, 4  ;;  %s1605_s16 = int_to_ptr.vmem [resolvable:$false] %s1604_s16 }
 0x152   : > { %s1606_s22 = scalar_lea.vmem %s1605_s16, 256  ;;  %p1607_p12 = scmp.lt.s32.totalorder %s1078_s5, %s1605_s16 }
 0x153   : > { %p1608_p2 = scmp.lt.s32.totalorder %s1606_s22, %s1600_s12 }
 0x155   : > { %p1609_p9 = por %p1608_p2, %p1607_p12 }
 0x157   : > { %p1610_p11 = pnand %p1609_p9, %p1603_p0 }
 0x1b9   : > { %v723_v29 = vpop.permute.xlu0 %722 }
 0x1ba   : > { %v728_v31 = vsel %vm671_vm2, %v723_v29, 0 }
 0x1bb   : > { %v720_v32 = vpop.permute.xlu1 %719  ;;  %1314 = vmatpush3.bf16.xpose.msra.mxu0 %v728_v31 }
 0x1bc   : > { %1325 = vmatprep.subr.bf16.mxu0 %v1711_v0 }
 0x1bd   : > { %v773_v34 = vpop.permute.xlu0 %772 }
 0x1be   : > { %v778_v35 = vsel %vm671_vm2, %v773_v34, 0 }
 0x1bf   : > { %v823_v36 = vpop.permute.xlu1 %822  ;;  %1320 = vmatpush3.bf16.xpose.msra.mxu1 %v778_v35 }
 0x1c0   : > { %1331 = vmatprep.subr.bf16.mxu1 %v1711_v0  ;;  %v828_v38 = vsel %vm671_vm2, %v823_v36, 0 }
 0x1c1   : > { %v771_v40 = vpop.permute.xlu0 %770 }
 0x1c2   : > { %1316 = vmatmul.mubr.msk.bf16.vlgmr.msra.gmra.mxu0 %vm671_vm2, %v720_v32 }
 0x1c3   : > { %1326 = vmatpush3.bf16.xpose.msra.mxu0 %v828_v38  ;;  %1327 = vmatprep.mubr.msk.bf16.mxu0 %vm1712_vm0, %v1711_v0  ;;  %v821_v41 = vpop.permute.xlu1 %820 }
 0x1c4   : > { %1337 = vmatprep.subr.bf16.mxu0 %v1711_v0 }
 0x1c6   : > { %1322 = vmatmul.mubr.msk.bf16.vlgmr.msra.gmra.mxu1 %vm671_vm2, %v771_v40 }
 0x1c7   : > { %1332 = vmatpush3.bf16.msra.mxu1 %v933_v39  ;;  %1333 = vmatprep.mubr.msk.bf16.mxu1 %vm1712_vm0, %v1711_v0 }
 0x1ca   : > { %1328 = vmatmul.mubr.msk.bf16.vlgmr.msra.gmra.mxu0 %vm671_vm2, %v821_v41 }
 0x1cb   : > { %1341 = vmatprep.mubr.msk.bf16.mxu0 %vm1712_vm0, %v1711_v0  ;;  %1338 = vmatpush3.bf16.msra.mxu0 %v1450_v24 }
 0x1cc   : > { %1339 = vmatprep.subr.bf16.mxu0 %v1711_v0 }
 0x20f   : > { %v712_v43 = vpop.f32.mrf.mxu1 }
 0x210   : > { %v871_v44 = vadd.f32 %v870_v42, %v712_v43 }
 0x211   : > { %v1311_v45 = vpop.f32.mrf.mxu1 }
 0x212   : > { %v875_v46 = vsel %vm671_vm2, %v871_v44, -inf  ;;  %v1451_v45 = vld [vmem:[#allocation10] sm:$0xff]  }
 0x213   : > { %876 = vmax.xlane.f32.xlu0 %v875_v46  ;;  %v715_v47 = vpop.f32.mrf.mxu1  ;;  %1340 = vmatpush3.bf16.msra.mxu0 %v1451_v45 }
 0x215   : > { %v1312_v48 = vpop.f32.mrf.mxu1 }
 0x282   : > { %v764_v49 = vpop.f32.mrf.mxu0 }
 0x283   : > { %v872_v50 = vadd.f32 %v870_v42, %v764_v49 }
 0x284   : > { %v1317_v51 = vpop.f32.mrf.mxu0 }
 0x285   : > { %v878_v52 = vsel %vm671_vm2, %v872_v50, -inf }
 0x286   : > { %v814_v53 = vpop.f32.mrf.mxu1  ;;  %879 = vmax.xlane.f32.xlu1 %v878_v52  ;;  %v767_v54 = vpop.f32.mrf.mxu0 }
 0x287   : > { %v873_v55 = vadd.f32 %v870_v42, %v814_v53 }
 0x288   : > { %v1318_v56 = vpop.f32.mrf.mxu0  ;;  %v1323_v57 = vpop.f32.mrf.mxu1 }
 0x289   : > { %v881_v58 = vsel %vm671_vm2, %v873_v55, -inf }
 0x28a   : > { %882 = vmax.xlane.f32.xlu0 %v881_v58  ;;  %v817_v59 = vpop.f32.mrf.mxu1  ;;  %v864_v60 = vpop.f32.mrf.mxu0 }
 0x28b   : > { %v874_v61 = vadd.f32 %v870_v42, %v864_v60 }
 0x28c   : > { %v1324_v62 = vpop.f32.mrf.mxu1  ;;  %v1329_v63 = vpop.f32.mrf.mxu0 }
 0x28d   : > { %v884_v1 = vsel %vm671_vm2, %v874_v61, -inf }
 0x28e   : > { %885 = vmax.xlane.f32.xlu0 %v884_v1  ;;  %v867_v2 = vpop.f32.mrf.mxu0 }
 0x290   : > { %v1330_v3 = vpop.f32.mrf.mxu0 }
 0x29c   : > { %v877_v4 = vpop.xlane.xlu0 %876 }
 0x29d   : > { %v887_v5 = vsub.f32 %v871_v44, %v877_v4 }
 0x29f   : > { %v891_v6 = vmul.f32 1.442695, %v887_v5 }
 0x2a1   : > { %1452 = vpow2.f32 %v891_v6 }
 0x2ae   : > { %v1453_v7 = vpop.eup %1452 }
 0x2af   : > { %v899_v8 = vsel %vm671_vm2, %v1453_v7, 0.0 }
 0x2b0   : > { %900 = vadd.xlane.f32.xlu1 %v899_v8 }
 0x30f   : > { %v880_v9 = vpop.xlane.xlu1 %879 }
 0x310   : > { %v888_v10 = vsub.f32 %v872_v50, %v880_v9 }
 0x312   : > { %v893_v11 = vmul.f32 1.442695, %v888_v10 }
 0x313   : > { %v883_v12 = vpop.xlane.xlu0 %882 }
 0x314   : > { %1454 = vpow2.f32 %v893_v11  ;;  %v889_v13 = vsub.f32 %v873_v55, %v883_v12 }
 0x316   : > { %v895_v14 = vmul.f32 1.442695, %v889_v13 }
 0x317   : > { %v886_v15 = vpop.xlane.xlu0 %885 }
 0x318   : > { %1456 = vpow2.f32 %v895_v14  ;;  %v890_v16 = vsub.f32 %v874_v61, %v886_v15 }
 0x31a   : > { %v897_v17 = vmul.f32 1.442695, %v890_v16 }
 0x31c   : > { %1458 = vpow2.f32 %v897_v17 }
 0x321   : > { %v1455_v18 = vpop.eup %1454 }
 0x322   : > { %v902_v19 = vsel %vm671_vm2, %v1455_v18, 0.0 }
 0x323   : > { %903 = vadd.xlane.f32.xlu0 %v902_v19 }
 0x325   : > { %v1457_v20 = vpop.eup %1456 }
 0x326   : > { %v905_v21 = vsel %vm671_vm2, %v1457_v20, 0.0 }
 0x327   : > { %906 = vadd.xlane.f32.xlu1 %v905_v21 }
 0x329   : > { %v1459_v22 = vpop.eup %1458 }
 0x32a   : > { %v908_v23 = vsel %vm671_vm2, %v1459_v22, 0.0 }
 0x32b   : > { %909 = vadd.xlane.f32.xlu0 %v908_v23 }
 0x339   : > { %v901_v25 = vpop.xlane.xlu1 %900 }
 0x33a   : > { %1460 = vrcp.f32 %v901_v25 }
 0x347   : > { %v1461_v29 = vpop.eup %1460 }
 0x348   : > { %v915_v32 = vmul.f32 %v1461_v29, %v1453_v7 }
 0x34a   : > { %v919_v36 = vsel %vm671_vm2, %v915_v32, 0.0 }
 0x3ac   : > { %v904_v26 = vpop.xlane.xlu0 %903 }
 0x3ad   : > { %1462 = vrcp.f32 %v904_v26 }
 0x3b0   : > { %v907_v27 = vpop.xlane.xlu1 %906 }
 0x3b1   : > { %1464 = vrcp.f32 %v907_v27 }
 0x3b4   : > { %v910_v28 = vpop.xlane.xlu0 %909 }
 0x3b5   : > { %1466 = vrcp.f32 %v910_v28 }
 0x3ba   : > { %v1463_v30 = vpop.eup %1462 }
 0x3bb   : > { %v916_v31 = vmul.f32 %v1463_v30, %v1455_v18 }
 0x3bd   : > { %v920_v34 = vsel %vm671_vm2, %v916_v31, 0.0 }
 0x3be   : > { %v1465_v33 = vpop.eup %1464  ;;  %v921_v38 = vadd.f32 %v920_v34, %v919_v36 }
 0x3bf   : > { %v917_v35 = vmul.f32 %v1465_v33, %v1457_v20 }
 0x3c1   : > { %v922_v0 = vsel %vm671_vm2, %v917_v35, 0.0 }
 0x3c2   : > { %v1467_v37 = vpop.eup %1466  ;;  %v923_v40 = vadd.f32 %v922_v0, %v921_v38 }
 0x3c3   : > { %v918_v39 = vmul.f32 %v1467_v37, %v1459_v22 }
 0x3c5   : > { %v924_v41 = vsel %vm671_vm2, %v918_v39, 0.0 }
 0x3c6   : > { %v925_v42 = vadd.f32 %v924_v41, %v923_v40 }
 0x3c8   : > { %v926_v43 = vmul.f32 0.25, %v925_v42 }
 0x3ca   : > { %v927_v44 = vpack.c.bf16 %v926_v43, %v926_v43  ;;  %1044 = vst.msk [vmem:[%s2023_s13] sm:$0xff] %vm671_vm2, %v926_v43 }
 0x3cc   : > { %1334 = vmatmul.mubr.msk.bf16.vlgmr.msra.gmra.mxu1 %vm671_vm2, %v927_v44 }
 0x48c   : > { %v969_v46 = vpop.f32.mrf.mxu1 }
 0x48d   : > { %v975_v47 = vpack.c.bf16 %v969_v46, %v969_v46 }
 0x48e   : > { %v1335_v48 = vpop.f32.mrf.mxu1 }
 0x48f   : > { %1342 = vmatmul.mubr.msk.bf16.vlgmr.msra.gmra.mxu0 %vm497_vm1, %v975_v47 }
 0x490   : > { %v972_v49 = vpop.f32.mrf.mxu1 }
 0x492   : > { %v1336_v50 = vpop.f32.mrf.mxu1 }
 0x493   : > { %1613 = shalt.err (!%p1610_p11)
}
 0x494   : > { %s1614_s15 = scalar_lea.hbm %s1075_s3, 128  ;;  %s1618_s13 = scalar_lea.hbm %s2120_s11, 256 }
 0x495   : > { %p1615_p13 = scmp.ne.s32.totalorder %s1075_s3, %s1614_s15  ;;  %p1619_p4 = scmp.lt.s32.totalorder %s1075_s3, %s2120_s11 }
 0x496   : > { %p1620_p6 = scmp.lt.s32.totalorder %s1618_s13, %s1614_s15 }
 0x497   : > { %p1616_p1 = pnand %p1615_p13, %p2149_p7 }
 0x498   : > { %p1621_p5 = por %p1620_p6, %p1619_p4 }
 0x499   : > { %p1617_p3 = pneg %p1616_p1 }
 0x49b   : > { %p1622_p8 = pnand %p1621_p5, %p1617_p3 }
 0x49d   : > { %1625 = shalt.err (!%p1622_p8)
}
 0x49e   : > { %1364 = dma.vmem_to_hbm [thread:$0]  (%p2149_p7), %s1078_s5, 128, %s1075_s3, %s1051_s24   ;;  %v1251_v51 = vld [vmem:[%s2117_s8] ss:$0 sm:$0xff] }
 0x49f   : > { %s463_s16 = scalar_lea.vmem [#allocation11], %s1945_s29  ;;  %s2065_s26 = scalar_lea.hbm %s2119_s10, %s1257_s19 }
 0x4a0   : > { %s1064_s22 = sshll.u32 %s463_s16, 4  ;;  %s1046_s3 = scalar_lea.sflag [#allocation4], %s1942_s7  ;;  %s2067_s22 = int_to_ptr.vmem [resolvable:$true] %s1064_s22 }
 0x4a1   : > { %s1626_s29 = scalar_lea.vmem %s2067_s22, 128  ;;  %s1717_s23 = smov [#allocation11]  }
 0x4a2   : > { %p1627_p10 = scmp.ne.s32.totalorder %s2067_s22, %s1626_s29  ;;  %s1630_s5 = sshll.u32 %s1717_s23, 4  ;;  %s1631_s5 = int_to_ptr.vmem [resolvable:$false] %s1630_s5 }
 0x4a3   : > { %s1632_s19 = scalar_lea.vmem %s1631_s5, 256  ;;  %p1633_p2 = scmp.lt.s32.totalorder %s2067_s22, %s1631_s5 }
 0x4a4   : > { %p1628_p0 = pnand %p1627_p10, %p2149_p7  ;;  %p1634_p9 = scmp.lt.s32.totalorder %s1632_s19, %s1626_s29 }
 0x4a6   : > { %p1629_p12 = pneg %p1628_p0  ;;  %p1635_p11 = por %p1634_p9, %p1633_p2 }
 0x4a8   : > { %p1636_p13 = pnand %p1635_p11, %p1629_p12 }
 0x54f   : > { %v1036_v52 = vpop.f32.mrf.mxu0 }
 0x550   : > { %v1037_v53 = vadd.f32 %v1251_v51, %v1036_v52 }
 0x551   : > { %v1343_v54 = vpop.f32.mrf.mxu0 }
 0x552   : > { %1042 = vst.msk [vmem:[%s463_s16] sm:$0xff] %vm497_vm1, %v1037_v53 }
 0x553   : > { %v1039_v55 = vpop.f32.mrf.mxu0 }
 0x554   : > { %1639 = shalt.err (!%p1636_p13)
}
 0x555   : > { %s1640_s24 = scalar_lea.hbm %s2065_s26, 128  ;;  %s1644_s28 = scalar_lea.hbm %s2119_s10, 256 }
 0x556   : > { %p1641_p1 = scmp.ne.s32.totalorder %s2065_s26, %s1640_s24  ;;  %p1645_p6 = scmp.lt.s32.totalorder %s2065_s26, %s2119_s10 }
 0x557   : > { %p1646_p5 = scmp.lt.s32.totalorder %s1644_s28, %s1640_s24 }
 0x558   : > { %p1642_p3 = pnand %p1641_p1, %p2149_p7 }
 0x559   : > { %p1647_p8 = por %p1646_p5, %p1645_p6 }
 0x55a   : > { %p1643_p4 = pneg %p1642_p3 }
 0x55c   : > { %p1648_p10 = pnand %p1647_p8, %p1643_p4 }
 0x55e   : > { %1651 = shalt.err (!%p1648_p10)
}
 0x55f   : > { %1363 = dma.vmem_to_hbm [thread:$0]  (%p2149_p7), %s2067_s22, 128, %s2065_s26, %s1046_s3   ;;  %v1344_v56 = vpop.f32.mrf.mxu0 }
 0x560 PF: > { %s1089_s25 = sand.u32 1, %s1690_s17   ;;  %p2150_p0 = scmp.ne.s32.totalorder %s2141_s14, 0 }
 0x561   : > { %p2151_p12 = scmp.ge.s32.totalorder %s1702_s20, 2  ;;  %s1090_s16 = scalar_lea.sflag [#allocation4], %s1089_s25 }
 0x563   : > { %p1385_p2 = pnand %p2151_p12, %p2150_p0 }
 0x565   : > { %p1386_p9 = pneg %p1385_p2 }
 0x567   : > { %1681 = dma.done.wait (%p1386_p9), %s1090_s16, 128  }
 0x568   : > { %1683 = vsyncadd (%p1386_p9), %s1090_s16, 4294967168  ;;  %s1099_s15 = scalar_lea.sflag [#allocation13], %s1089_s25 }
 0x569   : > { %1685 = dma.done.wait (%p1386_p9), %s1099_s15, 128  }
 0x56a   : > { %1687 = vsyncadd (%p1386_p9), %s1099_s15, 4294967168  ;;  %s2152_s30 = sld [smem:[#allocation19_spill]]  ;;  %p30_p7 = scmp.ge.s32.totalorder %s1879_s21, 4  }
 0x56b   : > { %s2153_s19 = sld [smem:[#allocation20_spill]]  ;;  %s2154_s17 = smov %s1694_s18 }
 0x56c   : > { %s2156_s20 = smov %s1879_s21  ;;  %32 = sbr.rel (!%p30_p7) target bundleno = 14 (0xe), region = 138 }
 0x570   : > { %s2155_s18 = smov %s2152_s30 }
 0x571   :  { %1104 = vsyncpa [#allocation3], 1 }
 0x572   :  { %1106 = vsyncpa [#allocation3 + $0x1], 1 }
 0x573   :  { %1107 = vsyncpa [#allocation6], 1 }
 0x574   :  { %1108 = vsyncpa [#allocation9], 1 }
 0x575   :  { %1109 = vsyncpa [#allocation4], 1 }
 0x576   :  { %1111 = vsyncpa [#allocation4 + $0x1], 1 }
 0x577   :  { %1112 = vsyncpa [#allocation13], 1 }
 0x578   :  { %1114 = vsyncpa [#allocation13 + $0x1], 1 }

</bundles_post_ra>
